<compile_context>
chip_gen: v5e
topology: v5e:2x2
jax: 0.10.0
libtpu: 0.0.40
codegen_flags: <defaults>
</compile_context>

<pallas_src>
import functools

import jax
import jax.numpy as jnp
from jax.experimental import pallas as pl
from jax.experimental.pallas import tpu as pltpu


# ---------------------------------------------------------------------------
# Model config (small synthetic shapes consistent with the torch module).
# ---------------------------------------------------------------------------
B = 2            # batch
T = 8            # num_tokens (<= context_length)
D_IN = 32        # d_in
D_OUT = 32       # d_out
NUM_HEADS = 4
HEAD_DIM = D_OUT // NUM_HEADS
CONTEXT_LENGTH = 16


# ---------------------------------------------------------------------------
# Pallas kernel: full MHA forward for the whole batch in one invocation.
# ---------------------------------------------------------------------------
def _mha_kernel(x_ref, wqkv_ref, wo_ref, cos_ref, sin_ref, o_ref, ctx_ref, *,
                num_heads, head_dim, seq_len, batch):
    d_out = num_heads * head_dim
    n_rows = num_heads * seq_len

    # Fused projection: ONE MXU issue emits [Q*scale | K | V | rot(Q)*scale |
    # rot(K)].  bf16 operands, f32 accumulation (native MXU path).
    x_bf = x_ref[...].astype(jnp.bfloat16)
    qkv = jnp.dot(x_bf, wqkv_ref[...], preferred_element_type=jnp.float32)

    q = qkv[:, 0 * d_out:1 * d_out]
    k = qkv[:, 1 * d_out:2 * d_out]
    v = qkv[:, 2 * d_out:3 * d_out]
    rq = qkv[:, 3 * d_out:4 * d_out]
    rk = qkv[:, 4 * d_out:5 * d_out]

    cosb = cos_ref[...]          # (T, d_out) f32
    sinb = sin_ref[...]

    # ---- In-kernel masks: VPU-only, nothing DMA'd from HBM. ---------------
    # f32 index math (floor of small exact ints) avoids vector i32 division.
    rr = jax.lax.broadcasted_iota(jnp.int32, (n_rows, d_out), 0).astype(jnp.float32)
    cc = jax.lax.broadcasted_iota(jnp.int32, (n_rows, d_out), 1).astype(jnp.float32)
    row_head = jnp.floor(rr * (1.0 / seq_len))
    col_head = jnp.floor(cc * (1.0 / head_dim))
    hmask = (row_head == col_head).astype(jnp.float32)          # (H*T, d_out)

    rs = jax.lax.broadcasted_iota(jnp.int32, (n_rows, seq_len), 0).astype(jnp.float32)
    cs = jax.lax.broadcasted_iota(jnp.int32, (n_rows, seq_len), 1).astype(jnp.float32)
    row_tok = rs - seq_len * jnp.floor(rs * (1.0 / seq_len))     # r mod T
    nmask = jnp.where(cs > row_tok, jnp.float32(-1e30), jnp.float32(0.0))

    # Attention per batch element (static unroll of 2, sublane slices only).
    # TODO(synk): at realistic batch convert this Python loop into a grid
    # axis ("parallel" -> both v7x TensorCores) or a lax.fori_loop.
    for b in range(batch):
        lo = b * seq_len

        # Interleaved RoPE as a pure FMA (rotation already folded into the
        # fused weights; softmax scale already folded into the Q columns).
        qb = q[lo:lo + seq_len, :] * cosb + rq[lo:lo + seq_len, :] * sinb
        kb = k[lo:lo + seq_len, :] * cosb + rk[lo:lo + seq_len, :] * sinb
        vb = v[lo:lo + seq_len, :]

        # Stack H copies of q along sublanes + head-block mask so one NT
        # matmul produces all per-head score tiles at once.
        # TODO(synk): at realistic T/head_dim drop this replicate-and-mask
        # trick (num_heads x redundant MACs) for a per-head grid/contraction.
        q_blk = jnp.concatenate([qb] * num_heads, axis=0) * hmask    # (H*T, d_out)

        s = jax.lax.dot_general(q_blk.astype(jnp.bfloat16),
                                kb.astype(jnp.bfloat16),
                                (((1,), (1,)), ((), ())),
                                preferred_element_type=jnp.float32)  # (H*T, T)
        s = s + nmask                                                # f32 mask add

        m = jnp.max(s, axis=-1, keepdims=True)
        p = jnp.exp(s - m)
        denom = jnp.sum(p, axis=-1, keepdims=True)
        w = p * pl.reciprocal(denom, approx=True)                    # EUP slot

        ctx_blk = jnp.dot(w.astype(jnp.bfloat16), vb.astype(jnp.bfloat16),
                          preferred_element_type=jnp.float32) * hmask
        # Collapse the head row-blocks: (H*T, d_out) -> (T, d_out).
        ctx_b = ctx_blk[0:seq_len, :]
        for h in range(1, num_heads):
            ctx_b = ctx_b + ctx_blk[h * seq_len:(h + 1) * seq_len, :]

        # Direct slice write into VMEM scratch (no list + concatenate copy).
        ctx_ref[lo:lo + seq_len, :] = ctx_b

    # Single deferred output projection for the whole batch.
    # TODO(synk): lane-dense output layout once d_out is a multiple of 128.
    o_ref[...] = jnp.dot(ctx_ref[...].astype(jnp.bfloat16), wo_ref[...],
                         preferred_element_type=jnp.float32).astype(o_ref.dtype)


# ---------------------------------------------------------------------------
# Parameter / buffer construction helpers (run ONCE at setup time).
# ---------------------------------------------------------------------------
def precompute_rope_params(seq_len, head_dim):
    half = head_dim // 2
    inv_freq = 1.0 / 10000 ** (jnp.arange(half, dtype=jnp.float32) / half)
    positions = jnp.arange(seq_len, dtype=jnp.float32)
    angles = positions[:, None] * inv_freq[None, :]           # (seq_len, half)
    return jnp.sin(angles), jnp.cos(angles)


def build_pair_rotation(width):
    # Block-diagonal [[0, 1], [-1, 0]] over consecutive (even, odd) pairs:
    #   (x @ R)[2i] = -x[2i+1],  (x @ R)[2i+1] = x[2i]
    r = jnp.zeros((width, width), jnp.float32)
    idx = jnp.arange(width // 2)
    r = r.at[2 * idx + 1, 2 * idx].set(-1.0)
    r = r.at[2 * idx, 2 * idx + 1].set(1.0)
    return r


def prepare_mha_params(wq_t, wk_t, wv_t, wo_t, *, num_heads=NUM_HEADS,
                       context_length=CONTEXT_LENGTH):
    """Fuse weights, fold the RoPE rotation + softmax scale, build RoPE tables.

    Called once at parameter-setup time (NOT per forward call)."""
    d_in, d_out = wq_t.shape
    head_dim = d_out // num_heads
    assert head_dim % 2 == 0, "head_dim must be even for interleaved RoPE"
    scale = 1.0 / head_dim ** 0.5

    rot = build_pair_rotation(d_out)               # pairs never straddle heads
    wq_s = wq_t * scale                            # fold 1/sqrt(head_dim) into Q
    # [Q*scale | K | V | rot(Q)*scale | rot(K)]  -> one fused projection.
    wqkv = jnp.concatenate([wq_s, wk_t, wv_t, wq_s @ rot, wk_t @ rot], axis=1)

    # Note: the torch module unpacks precompute_rope_params' (sin, cos) as
    # (cos, sin) and passes them back swapped into rotary_pos_emb, so the net
    # effect is standard interleaved RoPE -- which is what we build here.
    sin, cos = precompute_rope_params(context_length, head_dim)
    cos_tbl = jnp.tile(jnp.repeat(cos, 2, axis=-1), (1, num_heads))  # (ctx, d_out)
    sin_tbl = jnp.tile(jnp.repeat(sin, 2, axis=-1), (1, num_heads))

    return dict(wqkv=wqkv.astype(jnp.bfloat16),    # bf16 weights: half the DMA
                wo=wo_t.astype(jnp.bfloat16),
                cos=cos_tbl, sin=sin_tbl,
                num_heads=num_heads, head_dim=head_dim)


# ---------------------------------------------------------------------------
# Wrapper: calls the kernel once (no grid) on pre-fused parameters.
# ---------------------------------------------------------------------------
def multi_head_attention(x, params):
    b, t, d_in = x.shape
    num_heads = params["num_heads"]
    head_dim = params["head_dim"]
    d_out = num_heads * head_dim
    assert t % 8 == 0, "per-batch sublane slicing assumes T % 8 == 0 (f32 tile)"

    x2d = x.reshape(b * t, d_in)                   # fold batch into rows
    cos_t = params["cos"][:t]                      # (t, d_out), no batch tiling
    sin_t = params["sin"][:t]

    kernel = functools.partial(_mha_kernel, num_heads=num_heads,
                               head_dim=head_dim, seq_len=t, batch=b)

    # Single invocation, no grid: total resident data is a few KB, so one
    # whole-array VMEM launch beats any grid (each grid step costs ~0.35 us).
    # TODO(synk): at realistic B/T add a leading "parallel" grid axis over
    # batch (mandatory to use both v7x TensorCores) and tile K/V flash-style
    # (online softmax + VMEM accumulators), sizing tiles for 64 MiB VMEM on
    # v7x vs 128 MiB on v5e/v6e, with vmem_limit_bytes set explicitly.
    out2d = pl.pallas_call(
        kernel,
        out_shape=jax.ShapeDtypeStruct((b * t, d_out), x.dtype),
        scratch_shapes=[pltpu.VMEM((b * t, d_out), jnp.float32)],
    )(x2d, params["wqkv"], params["wo"], cos_t, sin_t)

    return out2d.reshape(b, t, d_out)


# ---------------------------------------------------------------------------
# Pure-JAX reference (mirrors the PyTorch forward) for a correctness check.
# ---------------------------------------------------------------------------
def mha_reference(x, wq_t, wk_t, wv_t, wo_t):
    b, t, _ = x.shape
    sin, cos = precompute_rope_params(CONTEXT_LENGTH, HEAD_DIM)
    sin, cos = sin[:t], cos[:t]

    def split(z):
        return z.reshape(b, t, NUM_HEADS, HEAD_DIM).transpose(0, 2, 1, 3)

    q, k, v = split(x @ wq_t), split(x @ wk_t), split(x @ wv_t)

    def rope(z):
        ze, zo = z[..., 0::2], z[..., 1::2]
        re = ze * cos - zo * sin
        ro = ze * sin + zo * cos
        return jnp.stack([re, ro], axis=-1).reshape(z.shape)

    q, k = rope(q), rope(k)
    s = jnp.einsum('bhqd,bhkd->bhqk', q, k)
    mask = jnp.triu(jnp.ones((t, t), bool), 1)
    s = jnp.where(mask[None, None], -jnp.inf, s)
    w = jax.nn.softmax(s / HEAD_DIM ** 0.5, axis=-1)
    ctx = jnp.einsum('bhqk,bhkd->bhqd', w, v).transpose(0, 2, 1, 3).reshape(b, t, D_OUT)
    return ctx @ wo_t


# ---------------------------------------------------------------------------
if __name__ == "__main__":
    key = jax.random.PRNGKey(0)
    kx, kq, kk, kv, ko = jax.random.split(key, 5)

    x = jax.random.normal(kx, (B, T, D_IN), dtype=jnp.float32)
    # nn.Linear(d_in, d_out, bias=False) weight is (d_out, d_in); we store W^T.
    wq_t = jax.random.normal(kq, (D_IN, D_OUT), dtype=jnp.float32) * 0.05
    wk_t = jax.random.normal(kk, (D_IN, D_OUT), dtype=jnp.float32) * 0.05
    wv_t = jax.random.normal(kv, (D_IN, D_OUT), dtype=jnp.float32) * 0.05
    wo_t = jax.random.normal(ko, (D_OUT, D_OUT), dtype=jnp.float32) * 0.05

    params = prepare_mha_params(wq_t, wk_t, wv_t, wo_t)        # setup-time fusion
    out = multi_head_attention(x, params)
    out = jax.block_until_ready(out)

    ref = jax.block_until_ready(mha_reference(x, wq_t, wk_t, wv_t, wo_t))
    assert out.shape == (B, T, D_OUT), out.shape
    # Tolerance loosened vs exact-f32 because matmul operands are bf16 (f32
    # accumulation) and the softmax uses the approximate EUP reciprocal.
    assert jnp.allclose(out, ref, atol=2e-2, rtol=2e-2), \
        float(jnp.max(jnp.abs(out - ref)))

    print("KERNEL_OK")
</pallas_src>

<mosaic_0001>
module attributes {stable_mosaic.version = 11 : i64} {
  func.func @_mha_kernel(%arg0: memref<16x32xf32, #tpu.memory_space<vmem>>, %arg1: memref<32x160xbf16, #tpu.memory_space<vmem>>, %arg2: memref<32x32xbf16, #tpu.memory_space<vmem>>, %arg3: memref<8x32xf32, #tpu.memory_space<vmem>>, %arg4: memref<8x32xf32, #tpu.memory_space<vmem>>, %arg5: memref<16x32xf32, #tpu.memory_space<vmem>>, %arg6: memref<16x32xf32, #tpu.memory_space<vmem>>) attributes {dimension_semantics = [], scalar_prefetch = 0 : i64, scratch_operands = 1 : i64, tpu.core_type = #tpu.core_type<tc>} {
    %c0 = arith.constant 0 : index
    %c0_0 = arith.constant 0 : index
    %0 = vector.load %arg0[%c0, %c0_0] : memref<16x32xf32, #tpu.memory_space<vmem>>, vector<16x32xf32>
    %1 = arith.truncf %0 : vector<16x32xf32> to vector<16x32xbf16>
    %c0_1 = arith.constant 0 : index
    %c0_2 = arith.constant 0 : index
    %2 = vector.load %arg1[%c0_1, %c0_2] : memref<32x160xbf16, #tpu.memory_space<vmem>>, vector<32x160xbf16>
    %cst = arith.constant dense<0.000000e+00> : vector<16x160xf32>
    %3 = tpu.matmul %1, %2, %cst {dimension_numbers = #tpu.dot_dimension_numbers<[1], [0], [0], [1], [0, 0, 1, 1], [], []>} : vector<16x32xbf16>, vector<32x160xbf16>, vector<16x160xf32> -> vector<16x160xf32>
    %4 = vector.extract_strided_slice %3 {offsets = [0, 0], sizes = [16, 32], strides = [1, 1]} : vector<16x160xf32> to vector<16x32xf32>
    %5 = vector.extract_strided_slice %3 {offsets = [0, 32], sizes = [16, 32], strides = [1, 1]} : vector<16x160xf32> to vector<16x32xf32>
    %6 = vector.extract_strided_slice %3 {offsets = [0, 64], sizes = [16, 32], strides = [1, 1]} : vector<16x160xf32> to vector<16x32xf32>
    %7 = vector.extract_strided_slice %3 {offsets = [0, 96], sizes = [16, 32], strides = [1, 1]} : vector<16x160xf32> to vector<16x32xf32>
    %8 = vector.extract_strided_slice %3 {offsets = [0, 128], sizes = [16, 32], strides = [1, 1]} : vector<16x160xf32> to vector<16x32xf32>
    %c0_3 = arith.constant 0 : index
    %c0_4 = arith.constant 0 : index
    %9 = vector.load %arg3[%c0_3, %c0_4] : memref<8x32xf32, #tpu.memory_space<vmem>>, vector<8x32xf32>
    %c0_5 = arith.constant 0 : index
    %c0_6 = arith.constant 0 : index
    %10 = vector.load %arg4[%c0_5, %c0_6] : memref<8x32xf32, #tpu.memory_space<vmem>>, vector<8x32xf32>
    %11 = tpu.iota {dimensions = array<i32: 0>} : vector<32x32xi32>
    %12 = arith.sitofp %11 : vector<32x32xi32> to vector<32x32xf32>
    %13 = tpu.iota {dimensions = array<i32: 1>} : vector<32x32xi32>
    %14 = arith.sitofp %13 : vector<32x32xi32> to vector<32x32xf32>
    %cst_7 = arith.constant 1.250000e-01 : f32
    %15 = vector.broadcast %cst_7 : f32 to vector<32x32xf32>
    %16 = arith.mulf %12, %15 : vector<32x32xf32>
    %17 = math.floor %16 : vector<32x32xf32>
    %cst_8 = arith.constant 1.250000e-01 : f32
    %18 = vector.broadcast %cst_8 : f32 to vector<32x32xf32>
    %19 = arith.mulf %14, %18 : vector<32x32xf32>
    %20 = math.floor %19 : vector<32x32xf32>
    %21 = arith.cmpf oeq, %17, %20 : vector<32x32xf32>
    %22 = arith.extui %21 : vector<32x32xi1> to vector<32x32xi32>
    %23 = arith.sitofp %22 : vector<32x32xi32> to vector<32x32xf32>
    %24 = tpu.iota {dimensions = array<i32: 0>} : vector<32x8xi32>
    %25 = arith.sitofp %24 : vector<32x8xi32> to vector<32x8xf32>
    %26 = tpu.iota {dimensions = array<i32: 1>} : vector<32x8xi32>
    %27 = arith.sitofp %26 : vector<32x8xi32> to vector<32x8xf32>
    %cst_9 = arith.constant 1.250000e-01 : f32
    %28 = vector.broadcast %cst_9 : f32 to vector<32x8xf32>
    %29 = arith.mulf %25, %28 : vector<32x8xf32>
    %30 = math.floor %29 : vector<32x8xf32>
    %cst_10 = arith.constant 8.000000e+00 : f32
    %31 = vector.broadcast %cst_10 : f32 to vector<32x8xf32>
    %32 = arith.mulf %31, %30 : vector<32x8xf32>
    %33 = arith.subf %25, %32 : vector<32x8xf32>
    %34 = arith.cmpf ogt, %27, %33 : vector<32x8xf32>
    %cst_11 = arith.constant -1.000000e+30 : f32
    %cst_12 = arith.constant 0.000000e+00 : f32
    %35 = vector.broadcast %cst_11 : f32 to vector<32x8xf32>
    %36 = vector.broadcast %cst_12 : f32 to vector<32x8xf32>
    %37 = arith.select %34, %35, %36 : vector<32x8xi1>, vector<32x8xf32>
    %38 = vector.extract_strided_slice %4 {offsets = [0, 0], sizes = [8, 32], strides = [1, 1]} : vector<16x32xf32> to vector<8x32xf32>
    %39 = arith.mulf %38, %9 : vector<8x32xf32>
    %40 = vector.extract_strided_slice %7 {offsets = [0, 0], sizes = [8, 32], strides = [1, 1]} : vector<16x32xf32> to vector<8x32xf32>
    %41 = arith.mulf %40, %10 : vector<8x32xf32>
    %42 = arith.addf %39, %41 : vector<8x32xf32>
    %43 = vector.extract_strided_slice %5 {offsets = [0, 0], sizes = [8, 32], strides = [1, 1]} : vector<16x32xf32> to vector<8x32xf32>
    %44 = arith.mulf %43, %9 : vector<8x32xf32>
    %45 = vector.extract_strided_slice %8 {offsets = [0, 0], sizes = [8, 32], strides = [1, 1]} : vector<16x32xf32> to vector<8x32xf32>
    %46 = arith.mulf %45, %10 : vector<8x32xf32>
    %47 = arith.addf %44, %46 : vector<8x32xf32>
    %48 = vector.extract_strided_slice %6 {offsets = [0, 0], sizes = [8, 32], strides = [1, 1]} : vector<16x32xf32> to vector<8x32xf32>
    %49 = tpu.concatenate %42, %42, %42, %42 in 0 : vector<8x32xf32>, vector<8x32xf32>, vector<8x32xf32>, vector<8x32xf32> -> vector<32x32xf32>
    %50 = arith.mulf %49, %23 : vector<32x32xf32>
    %51 = arith.truncf %50 : vector<32x32xf32> to vector<32x32xbf16>
    %52 = arith.truncf %47 : vector<8x32xf32> to vector<8x32xbf16>
    %cst_13 = arith.constant dense<0.000000e+00> : vector<32x8xf32>
    %53 = tpu.matmul %51, %52, %cst_13 {dimension_numbers = #tpu.dot_dimension_numbers<[1], [1], [0], [0], [0, 0, 1, 0], [], []>} : vector<32x32xbf16>, vector<8x32xbf16>, vector<32x8xf32> -> vector<32x8xf32>
    %54 = arith.addf %53, %37 : vector<32x8xf32>
    %cst_14 = arith.constant dense<0xFF800000> : vector<32xf32>
    %55 = vector.multi_reduction <maximumf>, %54, %cst_14 [1] : vector<32x8xf32> to vector<32xf32>
    %56 = vector.shape_cast %55 : vector<32xf32> to vector<32x1xf32>
    %57 = vector.broadcast %56 : vector<32x1xf32> to vector<32x8xf32>
    %58 = arith.subf %54, %57 : vector<32x8xf32>
    %59 = math.exp %58 : vector<32x8xf32>
    %cst_15 = arith.constant dense<0.000000e+00> : vector<32xf32>
    %60 = vector.multi_reduction <add>, %59, %cst_15 [1] : vector<32x8xf32> to vector<32xf32>
    %61 = vector.shape_cast %60 : vector<32xf32> to vector<32x1xf32>
    %62 = tpu.reciprocal %61 {approx = true} : vector<32x1xf32> -> vector<32x1xf32>
    %63 = vector.broadcast %62 : vector<32x1xf32> to vector<32x8xf32>
    %64 = arith.mulf %59, %63 : vector<32x8xf32>
    %65 = arith.truncf %64 : vector<32x8xf32> to vector<32x8xbf16>
    %66 = arith.truncf %48 : vector<8x32xf32> to vector<8x32xbf16>
    %cst_16 = arith.constant dense<0.000000e+00> : vector<32x32xf32>
    %67 = tpu.matmul %65, %66, %cst_16 {dimension_numbers = #tpu.dot_dimension_numbers<[1], [0], [0], [1], [0, 0, 1, 1], [], []>} : vector<32x8xbf16>, vector<8x32xbf16>, vector<32x32xf32> -> vector<32x32xf32>
    %68 = arith.mulf %67, %23 : vector<32x32xf32>
    %69 = vector.extract_strided_slice %68 {offsets = [0, 0], sizes = [8, 32], strides = [1, 1]} : vector<32x32xf32> to vector<8x32xf32>
    %70 = vector.extract_strided_slice %68 {offsets = [8, 0], sizes = [8, 32], strides = [1, 1]} : vector<32x32xf32> to vector<8x32xf32>
    %71 = arith.addf %69, %70 : vector<8x32xf32>
    %72 = vector.extract_strided_slice %68 {offsets = [16, 0], sizes = [8, 32], strides = [1, 1]} : vector<32x32xf32> to vector<8x32xf32>
    %73 = arith.addf %71, %72 : vector<8x32xf32>
    %74 = vector.extract_strided_slice %68 {offsets = [24, 0], sizes = [8, 32], strides = [1, 1]} : vector<32x32xf32> to vector<8x32xf32>
    %75 = arith.addf %73, %74 : vector<8x32xf32>
    %c0_17 = arith.constant 0 : index
    %c0_18 = arith.constant 0 : index
    %76 = vector.load %arg6[%c0_17, %c0_18] : memref<16x32xf32, #tpu.memory_space<vmem>>, vector<8x32xf32>
    tpu.vector_store %arg6[%c0_17, %c0_18], %75 {strides = array<i32>} : memref<16x32xf32, #tpu.memory_space<vmem>>, vector<8x32xf32>,
    %77 = vector.extract_strided_slice %4 {offsets = [8, 0], sizes = [8, 32], strides = [1, 1]} : vector<16x32xf32> to vector<8x32xf32>
    %78 = arith.mulf %77, %9 : vector<8x32xf32>
    %79 = vector.extract_strided_slice %7 {offsets = [8, 0], sizes = [8, 32], strides = [1, 1]} : vector<16x32xf32> to vector<8x32xf32>
    %80 = arith.mulf %79, %10 : vector<8x32xf32>
    %81 = arith.addf %78, %80 : vector<8x32xf32>
    %82 = vector.extract_strided_slice %5 {offsets = [8, 0], sizes = [8, 32], strides = [1, 1]} : vector<16x32xf32> to vector<8x32xf32>
    %83 = arith.mulf %82, %9 : vector<8x32xf32>
    %84 = vector.extract_strided_slice %8 {offsets = [8, 0], sizes = [8, 32], strides = [1, 1]} : vector<16x32xf32> to vector<8x32xf32>
    %85 = arith.mulf %84, %10 : vector<8x32xf32>
    %86 = arith.addf %83, %85 : vector<8x32xf32>
    %87 = vector.extract_strided_slice %6 {offsets = [8, 0], sizes = [8, 32], strides = [1, 1]} : vector<16x32xf32> to vector<8x32xf32>
    %88 = tpu.concatenate %81, %81, %81, %81 in 0 : vector<8x32xf32>, vector<8x32xf32>, vector<8x32xf32>, vector<8x32xf32> -> vector<32x32xf32>
    %89 = arith.mulf %88, %23 : vector<32x32xf32>
    %90 = arith.truncf %89 : vector<32x32xf32> to vector<32x32xbf16>
    %91 = arith.truncf %86 : vector<8x32xf32> to vector<8x32xbf16>
    %cst_19 = arith.constant dense<0.000000e+00> : vector<32x8xf32>
    %92 = tpu.matmul %90, %91, %cst_19 {dimension_numbers = #tpu.dot_dimension_numbers<[1], [1], [0], [0], [0, 0, 1, 0], [], []>} : vector<32x32xbf16>, vector<8x32xbf16>, vector<32x8xf32> -> vector<32x8xf32>
    %93 = arith.addf %92, %37 : vector<32x8xf32>
    %cst_20 = arith.constant dense<0xFF800000> : vector<32xf32>
    %94 = vector.multi_reduction <maximumf>, %93, %cst_20 [1] : vector<32x8xf32> to vector<32xf32>
    %95 = vector.shape_cast %94 : vector<32xf32> to vector<32x1xf32>
    %96 = vector.broadcast %95 : vector<32x1xf32> to vector<32x8xf32>
    %97 = arith.subf %93, %96 : vector<32x8xf32>
    %98 = math.exp %97 : vector<32x8xf32>
    %cst_21 = arith.constant dense<0.000000e+00> : vector<32xf32>
    %99 = vector.multi_reduction <add>, %98, %cst_21 [1] : vector<32x8xf32> to vector<32xf32>
    %100 = vector.shape_cast %99 : vector<32xf32> to vector<32x1xf32>
    %101 = tpu.reciprocal %100 {approx = true} : vector<32x1xf32> -> vector<32x1xf32>
    %102 = vector.broadcast %101 : vector<32x1xf32> to vector<32x8xf32>
    %103 = arith.mulf %98, %102 : vector<32x8xf32>
    %104 = arith.truncf %103 : vector<32x8xf32> to vector<32x8xbf16>
    %105 = arith.truncf %87 : vector<8x32xf32> to vector<8x32xbf16>
    %cst_22 = arith.constant dense<0.000000e+00> : vector<32x32xf32>
    %106 = tpu.matmul %104, %105, %cst_22 {dimension_numbers = #tpu.dot_dimension_numbers<[1], [0], [0], [1], [0, 0, 1, 1], [], []>} : vector<32x8xbf16>, vector<8x32xbf16>, vector<32x32xf32> -> vector<32x32xf32>
    %107 = arith.mulf %106, %23 : vector<32x32xf32>
    %108 = vector.extract_strided_slice %107 {offsets = [0, 0], sizes = [8, 32], strides = [1, 1]} : vector<32x32xf32> to vector<8x32xf32>
    %109 = vector.extract_strided_slice %107 {offsets = [8, 0], sizes = [8, 32], strides = [1, 1]} : vector<32x32xf32> to vector<8x32xf32>
    %110 = arith.addf %108, %109 : vector<8x32xf32>
    %111 = vector.extract_strided_slice %107 {offsets = [16, 0], sizes = [8, 32], strides = [1, 1]} : vector<32x32xf32> to vector<8x32xf32>
    %112 = arith.addf %110, %111 : vector<8x32xf32>
    %113 = vector.extract_strided_slice %107 {offsets = [24, 0], sizes = [8, 32], strides = [1, 1]} : vector<32x32xf32> to vector<8x32xf32>
    %114 = arith.addf %112, %113 : vector<8x32xf32>
    %c8 = arith.constant 8 : index
    %c0_23 = arith.constant 0 : index
    %115 = vector.load %arg6[%c8, %c0_23] : memref<16x32xf32, #tpu.memory_space<vmem>>, vector<8x32xf32>
    tpu.vector_store %arg6[%c8, %c0_23], %114 {strides = array<i32>} : memref<16x32xf32, #tpu.memory_space<vmem>>, vector<8x32xf32>,
    %c0_24 = arith.constant 0 : index
    %c0_25 = arith.constant 0 : index
    %116 = vector.load %arg6[%c0_24, %c0_25] : memref<16x32xf32, #tpu.memory_space<vmem>>, vector<16x32xf32>
    %117 = arith.truncf %116 : vector<16x32xf32> to vector<16x32xbf16>
    %c0_26 = arith.constant 0 : index
    %c0_27 = arith.constant 0 : index
    %118 = vector.load %arg2[%c0_26, %c0_27] : memref<32x32xbf16, #tpu.memory_space<vmem>>, vector<32x32xbf16>
    %cst_28 = arith.constant dense<0.000000e+00> : vector<16x32xf32>
    %119 = tpu.matmul %117, %118, %cst_28 {dimension_numbers = #tpu.dot_dimension_numbers<[1], [0], [0], [1], [0, 0, 1, 1], [], []>} : vector<16x32xbf16>, vector<32x32xbf16>, vector<16x32xf32> -> vector<16x32xf32>
    %c0_29 = arith.constant 0 : index
    %c0_30 = arith.constant 0 : index
    %120 = vector.load %arg5[%c0_29, %c0_30] : memref<16x32xf32, #tpu.memory_space<vmem>>, vector<16x32xf32>
    tpu.vector_store %arg5[%c0_29, %c0_30], %119 {strides = array<i32>} : memref<16x32xf32, #tpu.memory_space<vmem>>, vector<16x32xf32>,
    return
  }
}

</mosaic_0001>

<bundles_post_ra>
// kernel: tpu_custom_call.1
= control target key start
LH: loop header
LB: loop body
LE: loop exit
PB: predicated region body
PF: predicated region fallthrough
CT: control target
= control target key end

     0   :  { %10 = vsyncpa [#allocation4], 0  ;;  %s982_s0 = inlined_call_operand.hbm [shape: f32[16,32], index: 0, kind: input, shape index: {}]   ;;  %s983_s1 = inlined_call_operand.hbm [shape: bf16[32,160], index: 1, kind: input, shape index: {}]   ;;  %s984_s2 = inlined_call_operand.hbm [shape: bf16[32,32], index: 2, kind: input, shape index: {}]   ;;  %s985_s3 = inlined_call_operand.hbm [shape: f32[8,32], index: 3, kind: input, shape index: {}]   ;;  %s986_s4 = inlined_call_operand.hbm [shape: f32[8,32], index: 4, kind: input, shape index: {}]   ;;  %s987_s5 = inlined_call_operand.hbm [shape: f32[16,32], index: 5, kind: output, shape index: {}]  }
   0x1   :  { %11 = vsyncpa [#allocation7], 0 }
   0x2   :  { %12 = vsyncpa [#allocation10], 0 }
   0x3   :  { %13 = vsyncpa [#allocation5], 0  ;;  %s31_s20 = sshll.u32 %s983_s1, 4  ;;  %s794_s21 = smov [#allocation6]   ;;  %s32_s20 = int_to_ptr.hbm [resolvable:$true] %s31_s20 }
   0x4   :  { %s33_s22 = sshll.u32 %s794_s21, 4  ;;  %s58_s25 = sshll.u32 %s985_s3, 4  ;;  %s34_s22 = int_to_ptr.vmem [resolvable:$true] %s33_s22  ;;  %s59_s25 = int_to_ptr.hbm [resolvable:$true] %s58_s25 }
   0x5   :  { %s795_s26 = smov 128   ;;  %s796_s27 = smov 8  }
   0x6   :  { %39 = dma.hbm_to_vmem [thread:$0]  %s32_s20, 512, %s34_s22, [#allocation7], %s795_s26, %s795_s26, %s796_s27  }
   0x7   :  { %s797_s28 = smov [#allocation9]   ;;  %s18_s1 = sshll.u32 %s982_s0, 4  ;;  %s19_s1 = int_to_ptr.hbm [resolvable:$true] %s18_s1 }
   0x8   :  { %s60_s29 = sshll.u32 %s797_s28, 4  ;;  %s44_s3 = sshll.u32 %s984_s2, 4  ;;  %s61_s29 = int_to_ptr.vmem [resolvable:$true] %s60_s29  ;;  %s45_s3 = int_to_ptr.hbm [resolvable:$true] %s44_s3 }
   0x9   :  { %63 = dma.hbm_to_vmem [thread:$0]  %s59_s25, 128, %s61_s29, [#allocation10]  }
   0xa   :  { %s798_s9 = smov [#allocation3]   ;;  %s799_s11 = smov [#allocation8]  }
   0xb   :  { %s20_s10 = sshll.u32 %s798_s9, 4  ;;  %s46_s12 = sshll.u32 %s799_s11, 4  ;;  %s21_s10 = int_to_ptr.vmem [resolvable:$true] %s20_s10  ;;  %s47_s12 = int_to_ptr.vmem [resolvable:$true] %s46_s12 }
   0xc   :  { %26 = dma.hbm_to_vmem [thread:$0]  %s19_s1, 256, %s21_s10, [#allocation4], %s795_s26, %s795_s26, %s796_s27  }
   0xd   :  { %s800_s13 = smov 64   ;;  %s801_s0 = smov 4  }
   0xe   :  { %52 = dma.hbm_to_vmem [thread:$0]  %s45_s3, 256, %s47_s12, [#allocation7], %s800_s13, %s800_s13, %s801_s0  }
   0xf   :  { %s69_s2 = sshll.u32 %s986_s4, 4  ;;  %s802_s16 = smov [#allocation11]   ;;  %s70_s2 = int_to_ptr.hbm [resolvable:$true] %s69_s2 }
  0x10   :  { %s71_s17 = sshll.u32 %s802_s16, 4  ;;  %s72_s17 = int_to_ptr.vmem [resolvable:$true] %s71_s17 }
  0x11   :  { %74 = dma.hbm_to_vmem [thread:$0]  %s70_s2, 128, %s72_s17, [#allocation10]  }
  0x12   :  { %786 = dma.done.wait [#allocation4], 256  }
  0x13   :  { %787 = vsyncadd [#allocation4], 4294967040 }
  0x14   :  { %788 = dma.done.wait [#allocation7], 768  }
  0x15   :  { %789 = vsyncadd [#allocation7], 4294966528 }
  0x16   :  { %790 = dma.done.wait [#allocation10], 256  }
  0x17   :  { %791 = vsyncadd [#allocation10], 4294967040  ;;  %v593_v0 = vld [vmem:[#allocation6 + $0x14] sm:$0xf]  ;;  %v564_v1 = vld [vmem:[#allocation6 + $0x18] sm:$0xf0]  ;;  %v157_v35 = vlaneseq }
  0x18   :  { %v591_v2 = vld [vmem:[#allocation6 + $0x4] sm:$0xf]  ;;  %v567_v3 = vor.u32 %v593_v0, %v564_v1  ;;  %v556_v4 = vld [vmem:[#allocation6 + $0x8] sm:$0xf0]  ;;  %v96_v5 = vld [vmem:[#allocation3] sm:$0xff]  ;;  %s803_s4 = smov 96  }
  0x19   :  { %v97_v6 = vld [vmem:[#allocation3 + $0x8] sm:$0xff]  ;;  %v562_v7 = vld [vmem:[#allocation6 + $0x10] sm:$0xf]  ;;  %v554_v9 = vld [vmem:[#allocation6] sm:$0xf]  ;;  %v559_v10 = vor.u32 %v591_v2, %v556_v4  ;;  %s804_s18 = smov 32  }
  0x1a   :  { %v594_v8 = vld [vmem:[#allocation6 + $0x14] sm:$0xf0]  ;;  %147 = vmatpush.bf16.msra.mxu1 %v567_v3  ;;  %v592_v12 = vld [vmem:[#allocation6 + $0x4] sm:$0xf0]  ;;  %v860_v14 = vld [vmem:[#allocation9] sm:$0xff]  ;;  %v98_v16 = vpack.c.bf16 %v97_v6, %v96_v5  ;;  %vm123_vm0 = vcmask 261120  }
  0x1b   :  { %v563_v11 = vor.u32 %v594_v8, %v562_v7  ;;  %v156_v13 = vld [vmem:[#allocation11] sm:$0xff]  ;;  %219 = vrot.lane.b32.xlu0 %v860_v14, %s804_s18  ;;  %v555_v15 = vor.u32 %v592_v12, %v554_v9  ;;  %v158_v36 = vshrl.u32 %v157_v35, 7  ;;  %v167_v38 = vand.u32 127, %v157_v35  ;;  %s806_s19 = smov [#allocation12]   ;;  %s537_s23 = sshll.u32 %s987_s5, 4  ;;  %s538_s23 = int_to_ptr.hbm [resolvable:$true] %s537_s23 }
  0x1c   :  { %209 = vrot.lane.b32.xlu1 %v156_v13, %s803_s4  ;;  %v805_v57 = vmov 0.0   ;;  %vm267_vm6 = vcmask 64512   ;;  %vm324_vm10 = vcmask 1043456   ;;  %s535_s20 = sshll.u32 %s806_s19, 4  ;;  %s536_s20 = int_to_ptr.vmem [resolvable:$true] %s535_s20 }
  0x1d   :  { %133 = vmatpush.bf16.msra.mxu0 %v563_v11  ;;  %v159_v37 = vadd.s32 8, %v158_v36  ;;  %v162_v39 = vcvt.s32.f32 %v158_v36  ;;  %v881_v41 = vcvt.s32.f32 %v167_v38  ;;  %v885_v50 = vadd.s32 16, %v158_v36 }
  0x1e   :  { %148 = vmatpush.bf16.msra.mxu1 %v559_v10  ;;  %v161_v51 = vadd.s32 24, %v158_v36 }
  0x1f   :  { %v163_v40 = vcvt.s32.f32 %v159_v37  ;;  %v169_v42 = vmul.f32 0.125, %v162_v39  ;;  %v177_v44 = vmul.f32 0.125, %v881_v41  ;;  %v164_v55 = vcvt.s32.f32 %v885_v50 }
  0x20   :  { %v165_v56 = vcvt.s32.f32 %v161_v51 }
  0x21   :  { %134 = vmatpush.bf16.msra.mxu0 %v555_v15  ;;  %569 = vmatmul.msk.bf16.vlgmr.msra.gmra.mxu1 %vm123_vm0, %v98_v16  ;;  %v170_v43 = vmul.f32 0.125, %v163_v40  ;;  %v173_v47 = vfloor.f32 %v169_v42  ;;  %v178_v49 = vfloor.f32 %v177_v44  ;;  %v171_v63 = vmul.f32 0.125, %v164_v55 }
  0x22   :  { %v172_v0 = vmul.f32 0.125, %v165_v56 }
  0x23   :  { %v174_v48 = vfloor.f32 %v170_v43  ;;  %vm179_vm1 = vcmp.eq.f32.partialorder %v173_v47, %v178_v49  ;;  %v175_v1 = vfloor.f32 %v171_v63 }
  0x24   :  { %568 = vmatmul.msk.bf16.vlgmr.msra.gmra.mxu0 %vm123_vm0, %v98_v16  ;;  %v891_v58 = vsel %vm179_vm1, 1.0, %v805_v57  ;;  %v176_v2 = vfloor.f32 %v172_v0 }
  0x25   :  { %vm180_vm2 = vcmp.eq.f32.partialorder %v174_v48, %v178_v49  ;;  %vm181_vm3 = vcmp.eq.f32.partialorder %v175_v1, %v178_v49  ;;  %v193_v37 = vmul.f32 8.0, %v175_v1 }
  0x26   :  { %v894_v59 = vsel %vm180_vm2, 1.0, %v805_v57  ;;  %vm182_vm4 = vcmp.eq.f32.partialorder %v176_v2, %v178_v49  ;;  %v902_v3 = vsel %vm181_vm3, 1.0, %v805_v57 }
  0x27   :  { %v905_v4 = vsel %vm182_vm4, 1.0, %v805_v57  ;;  %v197_v43 = vsub.f32 %v164_v55, %v193_v37 }
  0x29   :  { %vm201_vm9 = vcmp.gt.f32.partialorder %v881_v41, %v197_v43 }
  0x2a   :  { %v205_v49 = vsel %vm201_vm9, -1e+30, %v805_v57 }
  0x8d   :  { %v220_v25 = vpop.permute.xlu0 %219 }
  0x8e   :  { %v210_v22 = vpop.permute.xlu1 %209 }
  0x9e   :  { %v150_v17 = vpop.f32.mrf.mxu1 }
  0x9f   :  { %v223_v18 = vmul.f32 %v156_v13, %v150_v17 }
  0xa1   :  { %v867_v19 = vpop.f32.mrf.mxu0  ;;  %225 = vrot.lane.b32.xlu0 %v223_v18, %s804_s18 }
  0xa2   :  { %v222_v26 = vmul.f32 %v220_v25, %v867_v19  ;;  %v212_v33 = vmul.f32 %v210_v22, %v867_v19  ;;  %v207_v52 = vmul.f32 %v860_v14, %v867_v19 }
  0xa6   :  { %v152_v20 = vpop.f32.mrf.mxu1 }
  0xa7   :  { %v363_v21 = vmul.f32 %v156_v13, %v152_v20  ;;  %v191_v20 = vmul.f32 8.0, %v173_v47 }
  0xa9   :  { %365 = vrot.lane.b32.xlu1 %v363_v21, %s804_s18  ;;  %v871_v23 = vpop.f32.mrf.mxu0  ;;  %v195_v21 = vsub.f32 %v162_v39, %v191_v20 }
  0xaa   :  { %v356_v24 = vmul.f32 %v210_v22, %v871_v23  ;;  %v362_v30 = vmul.f32 %v220_v25, %v871_v23  ;;  %v355_v8 = vmul.f32 %v860_v14, %v871_v23  ;;  %v192_v22 = vmul.f32 8.0, %v174_v48 }
  0xab   :  { %vm199_vm5 = vcmp.gt.f32.partialorder %v881_v41, %v195_v21 }
  0xac   :  { %v196_v25 = vsub.f32 %v163_v40, %v192_v22 }
  0xae   :  { %vm200_vm7 = vcmp.gt.f32.partialorder %v881_v41, %v196_v25 }
  0xb1   :  { %358 = vrot.lane.b32.xlu1 %v356_v24, %s804_s18  ;;  %v203_v24 = vsel %vm199_vm5, -1e+30, %v805_v57 }
 0x113   :  { %v226_v27 = vpop.permute.xlu0 %225 }
 0x114   :  { %v228_v28 = vadd.f32 %v226_v27, %v222_v26 }
 0x116   :  { %v235_v29 = vpack.c.bf16 %v228_v28, %v228_v28 }
 0x118   :  { %237 = vrot.lane.b32.xlu2 %v235_v29, %s803_s4  ;;  %v204_v29 = vsel %vm200_vm7, -1e+30, %v805_v57 }
 0x11b   :  { %v366_v31 = vpop.permute.xlu1 %365 }
 0x11c   :  { %v368_v32 = vadd.f32 %v366_v31, %v362_v30 }
 0x11e   :  { %v375_v34 = vpack.c.bf16 %v368_v32, %v368_v32 }
 0x120   :  { %214 = vrot.lane.b32.xlu2 %v212_v33, %s804_s18  ;;  %377 = vrot.lane.b32.xlu0 %v375_v34, %s803_s4  ;;  %v194_v33 = vmul.f32 8.0, %v176_v2 }
 0x122   :  { %v198_v34 = vsub.f32 %v165_v56, %v194_v33 }
 0x123   :  { %v359_v7 = vpop.permute.xlu1 %358 }
 0x124   :  { %v361_v10 = vadd.f32 %v359_v7, %v355_v8  ;;  %vm202_vm8 = vcmp.gt.f32.partialorder %v881_v41, %v198_v34 }
 0x125   :  { %v206_v39 = vsel %vm202_vm8, -1e+30, %v805_v57 }
 0x126   :  { %v369_v13 = vmul.f32 %v891_v58, %v361_v10  ;;  %v370_v15 = vmul.f32 %v894_v59, %v361_v10  ;;  %v371_v17 = vmul.f32 %v902_v3, %v361_v10  ;;  %v372_v18 = vmul.f32 %v905_v4, %v361_v10 }
 0x128   :  { %v373_v16 = vpack.c.bf16 %v370_v15, %v369_v13  ;;  %v374_v14 = vpack.c.bf16 %v372_v18, %v371_v17 }
 0x172   :  { %v238_v45 = vpop.permute.xlu2 %237 }
 0x173   :  { %v246_v46 = vsel %vm123_vm0, %v238_v45, 0 }
 0x174   :  { %255 = vmatpush.bf16.xpose.msra.mxu2 %v246_v46 }
 0x17a   :  { %v215_v53 = vpop.permute.xlu2 %214 }
 0x17b   :  { %v217_v54 = vadd.f32 %v215_v53, %v207_v52 }
 0x17d   :  { %v229_v60 = vmul.f32 %v891_v58, %v217_v54  ;;  %v230_v61 = vmul.f32 %v894_v59, %v217_v54  ;;  %v231_v5 = vmul.f32 %v902_v3, %v217_v54  ;;  %v232_v6 = vmul.f32 %v905_v4, %v217_v54 }
 0x17f   :  { %v233_v62 = vpack.c.bf16 %v230_v61, %v229_v60  ;;  %v234_v9 = vpack.c.bf16 %v232_v6, %v231_v5 }
 0x181   :  { %574 = vmatmul.msk.bf16.vlgmr.msra.gmra.mxu2 %vm123_vm0, %v233_v62 }
 0x191   :  { %575 = vmatmul.msk.bf16.gmra.mxu2 %vm123_vm0, %v234_v9 }
 0x192   :  { %v378_v11 = vpop.permute.xlu0 %377 }
 0x193   :  { %v386_v12 = vsel %vm123_vm0, %v378_v11, 0 }
 0x194   :  { %395 = vmatpush.bf16.xpose.msrb.mxu0 %v386_v12 }
 0x19b   :  { %578 = vmatmul.msk.bf16.vlgmr.msrb.gmra.mxu0 %vm123_vm0, %v373_v16 }
 0x1ab   :  { %579 = vmatmul.msk.bf16.gmra.mxu0 %vm123_vm0, %v374_v14 }
 0x204   :  { %v257_v26 = vpop.f32.mrf.mxu2 }
 0x205   :  { %v258_v27 = vadd.f32 %v257_v26, %v203_v24  ;;  %v314_v26 = vpack.c.bf16 %v867_v19, %v867_v19 }
 0x207   :  { %v268_v28 = vsel %vm267_vm6, %v258_v27, -inf }
 0x208   :  { %269 = vmax.xlane.f32.xlu2 %v268_v28 }
 0x20c   :  { %v259_v30 = vpop.f32.mrf.mxu2 }
 0x20d   :  { %v260_v31 = vadd.f32 %v259_v30, %v204_v29 }
 0x20f   :  { %v271_v32 = vsel %vm267_vm6, %v260_v31, -inf }
 0x210   :  { %272 = vmax.xlane.f32.xlu0 %v271_v32  ;;  %v453_v32 = vpack.c.bf16 %v871_v23, %v871_v23 }
 0x214   :  { %v262_v35 = vpop.f32.mrf.mxu2 }
 0x215   :  { %v263_v51 = vadd.f32 %v262_v35, %v205_v49 }
 0x217   :  { %v274_v54 = vsel %vm267_vm6, %v263_v51, -inf }
 0x218   :  { %v397_v36 = vpop.f32.mrf.mxu0 }
 0x219   :  { %v398_v38 = vadd.f32 %v397_v36, %v203_v24 }
 0x21b   :  { %v407_v40 = vsel %vm267_vm6, %v398_v38, -inf }
 0x21c   :  { %v264_v42 = vpop.f32.mrf.mxu2  ;;  %408 = vmax.xlane.f32.xlu1 %v407_v40 }
 0x21d   :  { %v265_v44 = vadd.f32 %v264_v42, %v206_v39 }
 0x21f   :  { %v277_v45 = vsel %vm267_vm6, %v265_v44, -inf }
 0x220   :  { %278 = vmax.xlane.f32.xlu0 %v277_v45  ;;  %v399_v46 = vpop.f32.mrf.mxu0 }
 0x221   :  { %v400_v47 = vadd.f32 %v399_v46, %v204_v29 }
 0x223   :  { %v410_v48 = vsel %vm267_vm6, %v400_v47, -inf }
 0x224   :  { %411 = vmax.xlane.f32.xlu2 %v410_v48 }
 0x228   :  { %v402_v52 = vpop.f32.mrf.mxu0 }
 0x229   :  { %v403_v53 = vadd.f32 %v402_v52, %v205_v49 }
 0x22b   :  { %v413_v50 = vsel %vm267_vm6, %v403_v53, -inf }
 0x22c   :  { %275 = vmax.xlane.f32.xlu2 %v274_v54  ;;  %414 = vmax.xlane.f32.xlu1 %v413_v50 }
 0x230   :  { %v404_v55 = vpop.f32.mrf.mxu0 }
 0x231   :  { %v405_v56 = vadd.f32 %v404_v55, %v206_v39 }
 0x233   :  { %v416_v60 = vsel %vm267_vm6, %v405_v56, -inf }
 0x234   :  { %417 = vmax.xlane.f32.xlu2 %v416_v60 }
 0x27b   :  { %v270_v41 = vpop.xlane.xlu2 %269 }
 0x27c   :  { %v280_v61 = vsub.f32 %v258_v27, %v270_v41 }
 0x27e   :  { %v284_v62 = vmul.f32 1.442695, %v280_v61 }
 0x280   :  { %610 = vpow2.f32 %v284_v62 }
 0x283   :  { %v273_v57 = vpop.xlane.xlu0 %272 }
 0x284   :  { %v281_v63 = vsub.f32 %v260_v31, %v273_v57 }
 0x286   :  { %v937_v0 = vpop.eup %610  ;;  %v286_v1 = vmul.f32 1.442695, %v281_v63 }
 0x287   :  { %v292_v2 = vsel %vm267_vm6, %v937_v0, 0.0 }
 0x288   :  { %612 = vpow2.f32 %v286_v1  ;;  %293 = vadd.xlane.f32.xlu0 %v292_v2 }
 0x28e   :  { %v941_v5 = vpop.eup %612 }
 0x28f   :  { %v409_v6 = vpop.xlane.xlu1 %408  ;;  %v295_v7 = vsel %vm267_vm6, %v941_v5, 0.0 }
 0x290   :  { %v419_v8 = vsub.f32 %v398_v38, %v409_v6  ;;  %296 = vadd.xlane.f32.xlu1 %v295_v7 }
 0x292   :  { %v423_v9 = vmul.f32 1.442695, %v419_v8 }
 0x293   :  { %v279_v16 = vpop.xlane.xlu0 %278 }
 0x294   :  { %614 = vpow2.f32 %v423_v9  ;;  %v283_v20 = vsub.f32 %v265_v44, %v279_v16 }
 0x296   :  { %v290_v24 = vmul.f32 1.442695, %v283_v20 }
 0x297   :  { %v412_v10 = vpop.xlane.xlu2 %411 }
 0x298   :  { %v420_v11 = vsub.f32 %v400_v47, %v412_v10 }
 0x29a   :  { %v615_v12 = vpop.eup %614  ;;  %v425_v13 = vmul.f32 1.442695, %v420_v11  ;;  %v596_v11 = vld [vmem:[#allocation8 + $0x8] sm:$0xff] }
 0x29b   :  { %v431_v15 = vsel %vm267_vm6, %v615_v12, 0.0 }
 0x29c   :  { %616 = vpow2.f32 %v425_v13  ;;  %432 = vadd.xlane.f32.xlu2 %v431_v15  ;;  %v595_v15 = vld [vmem:[#allocation8] sm:$0xff] }
 0x29f   :  { %v276_v17 = vpop.xlane.xlu2 %275  ;;  %v415_v25 = vpop.xlane.xlu1 %414 }
 0x2a0   :  { %v282_v18 = vsub.f32 %v263_v51, %v276_v17  ;;  %v421_v28 = vsub.f32 %v403_v53, %v415_v25 }
 0x2a2   :  { %v617_v14 = vpop.eup %616  ;;  %v288_v21 = vmul.f32 1.442695, %v282_v18  ;;  %v427_v30 = vmul.f32 1.442695, %v421_v28 }
 0x2a3   :  { %v434_v22 = vsel %vm267_vm6, %v617_v14, 0.0 }
 0x2a4   :  { %618 = vpow2.f32 %v288_v21  ;;  %435 = vadd.xlane.f32.xlu0 %v434_v22 }
 0x2a5   :  { %620 = vpow2.f32 %v290_v24 }
 0x2a6   :  { %622 = vpow2.f32 %v427_v30 }
 0x2a7   :  { %v418_v35 = vpop.xlane.xlu2 %417 }
 0x2a8   :  { %v422_v36 = vsub.f32 %v405_v56, %v418_v35 }
 0x2a9   :  { %316 = vrot.lane.b32.xlu1 %v314_v26, %s800_s13 }
 0x2aa   :  { %v619_v27 = vpop.eup %618  ;;  %v429_v37 = vmul.f32 1.442695, %v422_v36 }
 0x2ab   :  { %v298_v29 = vsel %vm267_vm6, %v619_v27, 0.0  ;;  %v621_v31 = vpop.eup %620 }
 0x2ac   :  { %299 = vadd.xlane.f32.xlu0 %v298_v29  ;;  %v301_v33 = vsel %vm267_vm6, %v621_v31, 0.0  ;;  %v623_v19 = vpop.eup %622  ;;  %624 = vpow2.f32 %v429_v37 }
 0x2ad   :  { %v437_v34 = vsel %vm267_vm6, %v623_v19, 0.0 }
 0x2b2   :  { %v625_v38 = vpop.eup %624 }
 0x2b3   :  { %v440_v39 = vsel %vm267_vm6, %v625_v38, 0.0 }
 0x2b4   :  { %302 = vadd.xlane.f32.xlu0 %v301_v33  ;;  %455 = vrot.lane.b32.xlu2 %v453_v32, %s800_s13 }
 0x2bc   :  { %438 = vadd.xlane.f32.xlu0 %v437_v34 }
 0x2d3   :  { %441 = vadd.xlane.f32.xlu1 %v440_v39 }
 0x2fb   :  { %v294_v42 = vpop.xlane.xlu0 %293 }
 0x303   :  { %v297_v40 = vpop.xlane.xlu1 %296 }
 0x304   :  { %626 = vrcp.f32 %v297_v40 }
 0x305   :  { %628 = vrcp.f32 %v294_v42 }
 0x30a   :  { %v627_v43 = vpop.eup %626 }
 0x30b   :  { %v629_v47 = vpop.eup %628  ;;  %v309_v48 = vmul.f32 %v627_v43, %v941_v5 }
 0x30c   :  { %v308_v53 = vmul.f32 %v629_v47, %v937_v0 }
 0x30e   :  { %v312_v50 = vpack.c.bf16 %v309_v48, %v308_v53 }
 0x30f   :  { %v433_v23 = vpop.xlane.xlu2 %432 }
 0x310   :  { %630 = vrcp.f32 %v433_v23 }
 0x316   :  { %v631_v51 = vpop.eup %630 }
 0x317   :  { %v436_v44 = vpop.xlane.xlu0 %435  ;;  %v456_v45 = vpop.permute.xlu2 %455  ;;  %v447_v55 = vmul.f32 %v631_v51, %v615_v12 }
 0x318   :  { %632 = vrcp.f32 %v436_v44  ;;  %v464_v46 = vsel %vm324_vm10, %v456_v45, 0 }
 0x319   :  { %473 = vmatpush.bf16.msrb.mxu1 %v464_v46 }
 0x31b   :  { %v317_v49 = vpop.permute.xlu1 %316 }
 0x31c   :  { %v326_v52 = vsel %vm324_vm10, %v317_v49, 0 }
 0x31d   :  { %335 = vmatpush.bf16.msra.mxu3 %v326_v52 }
 0x31e   :  { %v633_v54 = vpop.eup %632 }
 0x31f   :  { %v448_v56 = vmul.f32 %v633_v54, %v617_v14  ;;  %v300_v60 = vpop.xlane.xlu0 %299 }
 0x320   :  { %576 = vmatmul.msk.bf16.vlgmr.msra.gmra.mxu3 %vm267_vm6, %v312_v50  ;;  %634 = vrcp.f32 %v300_v60 }
 0x321   :  { %v451_v41 = vpack.c.bf16 %v448_v56, %v447_v55  ;;  %521 = vmatpush.bf16.msrb.mxu3 %v596_v11 }
 0x323   :  { %580 = vmatmul.msk.bf16.vlgmr.msrb.gmra.mxu1 %vm267_vm6, %v451_v41 }
 0x325   :  { %522 = vmatpush.bf16.msrb.mxu3 %v595_v15 }
 0x326   :  { %v635_v62 = vpop.eup %634 }
 0x327   :  { %v303_v61 = vpop.xlane.xlu0 %302  ;;  %v310_v63 = vmul.f32 %v635_v62, %v619_v27 }
 0x328   :  { %636 = vrcp.f32 %v303_v61 }
 0x32e   :  { %v637_v57 = vpop.eup %636 }
 0x32f   :  { %v311_v1 = vmul.f32 %v637_v57, %v621_v31  ;;  %v439_v0 = vpop.xlane.xlu0 %438 }
 0x330   :  { %638 = vrcp.f32 %v439_v0 }
 0x331   :  { %v313_v2 = vpack.c.bf16 %v311_v1, %v310_v63 }
 0x333   :  { %577 = vmatmul.msk.bf16.gmra.mxu3 %vm267_vm6, %v313_v2 }
 0x336   :  { %v639_v6 = vpop.eup %638 }
 0x337   :  { %v449_v8 = vmul.f32 %v639_v6, %v623_v19 }
 0x346   :  { %v442_v5 = vpop.xlane.xlu1 %441 }
 0x347   :  { %640 = vrcp.f32 %v442_v5 }
 0x34d   :  { %v641_v7 = vpop.eup %640 }
 0x34e   :  { %v450_v9 = vmul.f32 %v641_v7, %v625_v38 }
 0x350   :  { %v452_v10 = vpack.c.bf16 %v450_v9, %v449_v8 }
 0x352   :  { %581 = vmatmul.msk.bf16.gmra.mxu1 %vm267_vm6, %v452_v10 }
 0x3a0   :  { %v475_v20 = vpop.f32.mrf.mxu1 }
 0x3a1   :  { %v485_v30 = vmul.f32 %v891_v58, %v475_v20 }
 0x3a3   :  { %v337_v12 = vpop.f32.mrf.mxu3 }
 0x3a4   :  { %v347_v18 = vmul.f32 %v891_v58, %v337_v12 }
 0x3a8   :  { %v477_v27 = vpop.f32.mrf.mxu1 }
 0x3a9   :  { %v486_v29 = vmul.f32 %v894_v59, %v477_v27 }
 0x3ab   :  { %v339_v13 = vpop.f32.mrf.mxu3  ;;  %v489_v32 = vadd.f32 %v486_v29, %v485_v30 }
 0x3ac   :  { %v348_v17 = vmul.f32 %v894_v59, %v339_v13 }
 0x3ae   :  { %v351_v21 = vadd.f32 %v348_v17, %v347_v18 }
 0x3b6   :  { %v342_v16 = vpop.f32.mrf.mxu3 }
 0x3b7   :  { %v349_v14 = vmul.f32 %v902_v3, %v342_v16 }
 0x3b9   :  { %v352_v24 = vadd.f32 %v351_v21, %v349_v14 }
 0x3be   :  { %v344_v22 = vpop.f32.mrf.mxu3 }
 0x3bf   :  { %v350_v25 = vmul.f32 %v905_v4, %v344_v22 }
 0x3c1   :  { %v353_v26 = vadd.f32 %v352_v24, %v350_v25 }
 0x3c3   :  { %354 = vst.msk [vmem:[#allocation2] sm:$0xff] %vm123_vm0, %v353_v26 }
 0x3ca   :  { %v493_v36 = vld [vmem:[#allocation2] sm:$0xff] }
 0x3cf   :  { %v480_v28 = vpop.f32.mrf.mxu1 }
 0x3d0   :  { %v487_v31 = vmul.f32 %v902_v3, %v480_v28 }
 0x3d2   :  { %v490_v19 = vadd.f32 %v489_v32, %v487_v31 }
 0x3d7   :  { %v482_v33 = vpop.f32.mrf.mxu1 }
 0x3d8   :  { %v488_v34 = vmul.f32 %v905_v4, %v482_v33 }
 0x3da   :  { %v491_v35 = vadd.f32 %v490_v19, %v488_v34 }
 0x3dc   :  { %492 = vst.msk [vmem:[#allocation2 + $0x8] sm:$0xff] %vm123_vm0, %v491_v35 }
 0x3e3   :  { %v494_v37 = vld [vmem:[#allocation2 + $0x8] sm:$0xff] }
 0x3e4   :  { %v495_v38 = vpack.c.bf16 %v494_v37, %v493_v36 }
 0x3e6   :  { %590 = vmatmul.msk.bf16.vlgmr.msrb.gmra.mxu3 %vm123_vm0, %v495_v38 }
 0x469   :  { %v524_v39 = vpop.f32.mrf.mxu3 }
 0x46a   :  { %529 = vst.msk [vmem:[#allocation12] sm:$0xff] %vm123_vm0, %v524_v39 }
 0x471   :  { %v526_v58 = vpop.f32.mrf.mxu3 }
 0x472   :  { %530 = vst.msk [vmem:[#allocation12 + $0x8] sm:$0xff] %vm123_vm0, %v526_v58 }
 0x473   :  { %543 = dma.vmem_to_hbm [thread:$0]  %s536_s20, 256, %s538_s23, [#allocation5], %s795_s26, %s795_s26, %s796_s27  }
 0x474   :  { %792 = dma.done.wait [#allocation5], 256  }
 0x475   :  { %793 = vsyncadd [#allocation5], 4294967040 }
 0x476   :  { %548 = vsyncpa [#allocation4], 1 }
 0x477   :  { %549 = vsyncpa [#allocation7], 1 }
 0x478   :  { %550 = vsyncpa [#allocation10], 1 }
 0x479   :  { %551 = vsyncpa [#allocation5], 1 }

</bundles_post_ra>
